<compile_context>
chip_gen: v6e
topology: v6e:2x2x1
jax: 0.10.0
libtpu: 0.0.40
codegen_flags: <defaults>
</compile_context>

<pallas_src>
import functools

import jax
import jax.numpy as jnp
from jax import lax
from jax.experimental import pallas as pl
from jax.experimental.pallas import tpu as pltpu

_EPS = 1e-12  # matches torch.nn.functional.normalize default eps


# ----------------------------------------------------------------------------
# helpers
# ----------------------------------------------------------------------------
def _round_up(x, m):
    return ((x + m - 1) // m) * m


def _balanced_tile(size, cap, align, min_tiles=1):
    """Largest aligned tile <= cap that splits `size` into near-equal tiles."""
    size_a = _round_up(max(int(size), 1), align)
    max_tiles = size_a // align
    num = min(max(min_tiles, pl.cdiv(size_a, cap)), max_tiles)
    return _round_up(pl.cdiv(size_a, num), align)


def _pad2(a, rows, cols):
    r, c = a.shape
    if r == rows and c == cols:
        return a
    return jnp.pad(a, ((0, rows - r), (0, cols - c)))


def _inv_norm(sum_sq):
    # rsqrt(max(||.||^2, eps^2)) == 1 / max(||.||, eps); eps^2 is a normal f32.
    return lax.rsqrt(jnp.maximum(sum_sq, _EPS * _EPS))


def _sublane_align(dtype):
    return 16 if jnp.dtype(dtype).itemsize == 2 else 8


# ----------------------------------------------------------------------------
# kernel
# ----------------------------------------------------------------------------
def _normed_linear_kernel(x_ref, w_ref, xs_ref, ws_ref, o_ref, acc_ref):
    k = pl.program_id(2)

    @pl.when(k == 0)
    def _():
        acc_ref[...] = jnp.zeros_like(acc_ref)

    # Pure MXU matmul in the hot K loop (operands already in mxu dtype,
    # f32 accumulation).  Normalization is a separable rank-1 output scale,
    # applied only in the epilogue.
    acc_ref[...] += jnp.dot(x_ref[...], w_ref[...],
                            preferred_element_type=jnp.float32)

    @pl.when(k == pl.num_programs(2) - 1)
    def _():
        # (tm,1) row scales * (1,tn) column scales, both precomputed in f32.
        o_ref[...] = (acc_ref[...] * xs_ref[...] * ws_ref[...]).astype(o_ref.dtype)


def _normed_linear_padded(x_p, w_p, xs_p, ws_p, *, tm, tn, tk):
    m_p, k_p = x_p.shape
    _, n_p = w_p.shape
    grid = (m_p // tm, n_p // tn, k_p // tk)
    return pl.pallas_call(
        _normed_linear_kernel,
        out_shape=jax.ShapeDtypeStruct((m_p, n_p), jnp.float32),
        grid_spec=pltpu.PrefetchScalarGridSpec(
            num_scalar_prefetch=0,
            grid=grid,
            in_specs=[
                pl.BlockSpec((tm, tk), lambda i, j, k: (i, k)),   # x tile
                pl.BlockSpec((tk, tn), lambda i, j, k: (k, j)),   # w tile
                pl.BlockSpec((tm, 1), lambda i, j, k: (i, 0)),    # row scales
                pl.BlockSpec((1, tn), lambda i, j, k: (0, j)),    # col scales
            ],
            out_specs=pl.BlockSpec((tm, tn), lambda i, j, k: (i, j)),
            scratch_shapes=[pltpu.VMEM((tm, tn), jnp.float32)],   # f32 acc
        ),
        compiler_params=pltpu.CompilerParams(
            dimension_semantics=("parallel", "parallel", "arbitrary")),
    )(x_p, w_p, xs_p, ws_p)


# ----------------------------------------------------------------------------
# wrappers
# ----------------------------------------------------------------------------
def _prepare_weight(weight, *, mxu_dtype, tn_max, tk_max, min_n_tiles):
    """Pad/cast the weight and compute its column inverse norms (cacheable)."""
    c_in, c_out = weight.shape
    tk = _balanced_tile(c_in, tk_max, 128)
    tn = _balanced_tile(c_out, tn_max, 128, min_tiles=min_n_tiles)
    k_p = _round_up(c_in, tk)
    n_p = _round_up(c_out, tn)
    w32 = jnp.asarray(weight, jnp.float32)
    ws = _inv_norm(jnp.sum(w32 * w32, axis=0, keepdims=True))     # (1, c_out)
    w_p = _pad2(w32, k_p, n_p).astype(mxu_dtype)                  # zero padding
    ws_p = _pad2(ws, 1, n_p)                                      # padded cols -> 0
    return w_p, ws_p, tn, tk


def _prepare_input(x, k_p, tm, mxu_dtype):
    n = x.shape[0]
    m_p = _round_up(n, tm)
    x32 = jnp.asarray(x, jnp.float32)
    xs = _inv_norm(jnp.sum(x32 * x32, axis=1, keepdims=True))     # (n, 1) f32
    x_p = _pad2(x32, m_p, k_p).astype(mxu_dtype)                  # zero padding
    xs_p = _pad2(xs, m_p, 1)                                      # padded rows -> 0
    return x_p, xs_p


def normed_linear(x, weight, *, mxu_dtype=jnp.bfloat16,
                  tm_max=512, tn_max=512, tk_max=1024):
    """out = F.normalize(x, dim=1) @ F.normalize(weight, dim=0).

    x: (N, in_features), weight: (in_features, out_features); f32 output.
    Default bf16 MXU operands with f32 accumulation and f32 norm math; pass
    mxu_dtype=jnp.float32 for bit-faithful module numerics.
    For repeated calls with a fixed weight use make_normed_linear() so the
    weight padding / cast / column norms are computed only once.
    """
    n, c_in = x.shape
    c_in_w, c_out = weight.shape
    assert c_in == c_in_w, "in_features mismatch"

    tm = _balanced_tile(n, tm_max, _sublane_align(mxu_dtype))
    m_p = _round_up(n, tm)
    # Keep both v7x TensorCores busy: if M is a single tile, split N instead.
    min_n_tiles = 1 if (m_p // tm) >= 2 else 2

    w_p, ws_p, tn, tk = _prepare_weight(
        weight, mxu_dtype=mxu_dtype, tn_max=tn_max, tk_max=tk_max,
        min_n_tiles=min_n_tiles)
    x_p, xs_p = _prepare_input(x, w_p.shape[0], tm, mxu_dtype)

    out_p = _normed_linear_padded(x_p, w_p, xs_p, ws_p, tm=tm, tn=tn, tk=tk)
    return out_p[:n, :c_out]


def make_normed_linear(weight, *, mxu_dtype=jnp.bfloat16,
                       tm_max=512, tn_max=512, tk_max=1024, min_n_tiles=2):
    """Prepare the weight once (pad + cast + column norms) and return a jitted
    apply(x) closure -- the per-call weight prep is hoisted out of the forward
    path (it is otherwise a full extra HBM read+write of the weight)."""
    c_in, c_out = weight.shape
    w_p, ws_p, tn, tk = _prepare_weight(
        weight, mxu_dtype=mxu_dtype, tn_max=tn_max, tk_max=tk_max,
        min_n_tiles=min_n_tiles)
    k_p = w_p.shape[0]
    sub = _sublane_align(mxu_dtype)

    @jax.jit
    def apply(x):
        n, ci = x.shape
        assert ci == c_in, "in_features mismatch"
        tm = _balanced_tile(n, tm_max, sub)
        x_p, xs_p = _prepare_input(x, k_p, tm, mxu_dtype)
        out_p = _normed_linear_padded(x_p, w_p, xs_p, ws_p, tm=tm, tn=tn, tk=tk)
        return out_p[:n, :c_out]

    return apply


# ----------------------------------------------------------------------------
# init + reference
# ----------------------------------------------------------------------------
def init_normed_linear_weight(key, in_features, out_features):
    """torch: Tensor(in,out).uniform_(-1,1).renorm_(2, 1, 1e-5).mul_(1e5)."""
    w = jax.random.uniform(key, (in_features, out_features), dtype=jnp.float32,
                           minval=-1.0, maxval=1.0)
    col_norm = jnp.sqrt(jnp.sum(w * w, axis=0, keepdims=True))
    maxnorm = 1e-5
    scale = jnp.where(col_norm > maxnorm, maxnorm / (col_norm + 1e-7), 1.0)
    return w * scale * 1e5


def _reference(x, w):
    x_n = x / jnp.maximum(jnp.sqrt(jnp.sum(x * x, axis=1, keepdims=True)), _EPS)
    w_n = w / jnp.maximum(jnp.sqrt(jnp.sum(w * w, axis=0, keepdims=True)), _EPS)
    return x_n @ w_n


if __name__ == "__main__":
    key = jax.random.PRNGKey(0)
    k_x, k_w, k_x2, k_w2 = jax.random.split(key, 4)

    # Small classifier-head shapes consistent with the module.
    batch, in_features, out_features = 8, 32, 16
    x = jax.random.normal(k_x, (batch, in_features), dtype=jnp.float32)
    weight = init_normed_linear_weight(k_w, in_features, out_features)
    ref = _reference(x, weight)

    # f32 MXU path: bit-faithful to the module numerics.
    out_f32 = jax.block_until_ready(
        jax.jit(functools.partial(normed_linear, mxu_dtype=jnp.float32))(x, weight))
    assert out_f32.shape == (batch, out_features)
    assert jnp.allclose(out_f32, ref, atol=1e-5, rtol=1e-5), "f32 path mismatch"

    # Default bf16 MXU path (f32 accumulation + f32 norms): tolerance-gated.
    out_bf16 = jax.block_until_ready(jax.jit(normed_linear)(x, weight))
    assert out_bf16.shape == (batch, out_features)
    assert jnp.allclose(out_bf16, ref, atol=3e-2, rtol=3e-2), "bf16 path mismatch"

    # Non-aligned dims: exercises zero padding, balanced tiles, multi-tile N
    # grid (>=2 parallel blocks) and the cached-weight path.
    x2 = jax.random.normal(k_x2, (48, 160), dtype=jnp.float32)
    w2 = init_normed_linear_weight(k_w2, 160, 272)
    apply2 = make_normed_linear(w2)           # weight prepared exactly once
    out2 = jax.block_until_ready(apply2(x2))
    ref2 = _reference(x2, w2)
    assert out2.shape == (48, 272)
    assert jnp.allclose(out2, ref2, atol=3e-2, rtol=3e-2), "cached-weight path mismatch"

    print("KERNEL_OK")
</pallas_src>

<mosaic_0001>
module attributes {stable_mosaic.version = 11 : i64} {
  func.func @_normed_linear_kernel(%arg0: i32, %arg1: i32, %arg2: i32, %arg3: memref<8x128xf32, #tpu.memory_space<vmem>>, %arg4: memref<128x128xf32, #tpu.memory_space<vmem>>, %arg5: memref<8x1xf32, #tpu.memory_space<vmem>>, %arg6: memref<1x128xf32, #tpu.memory_space<vmem>>, %arg7: memref<8x128xf32, #tpu.memory_space<vmem>>, %arg8: memref<8x128xf32, #tpu.memory_space<vmem>>) attributes {dimension_semantics = [#tpu.dimension_semantics<parallel>, #tpu.dimension_semantics<parallel>, #tpu.dimension_semantics<arbitrary>], iteration_bounds = array<i64: 1, 1, 1>, scalar_prefetch = 0 : i64, scratch_operands = 1 : i64, tpu.core_type = #tpu.core_type<tc>, window_params = [{transform_indices = @transform_0, window_bounds = array<i64: 8, 128>}, {transform_indices = @transform_1, window_bounds = array<i64: 128, 128>}, {transform_indices = @transform_2, window_bounds = array<i64: 8, 1>}, {transform_indices = @transform_3, window_bounds = array<i64: 1, 128>}, {transform_indices = @transform_4, window_bounds = array<i64: 8, 128>}]} {
    %c0_i32 = arith.constant 0 : i32
    %0 = arith.cmpi eq, %arg2, %c0_i32 : i32
    %1 = arith.extui %0 : i1 to i32
    %c0_i32_0 = arith.constant 0 : i32
    %2 = arith.cmpi ne, %1, %c0_i32_0 : i32
    scf.if %2 {
      %cst_10 = arith.constant 0.000000e+00 : f32
      %12 = vector.broadcast %cst_10 : f32 to vector<8x128xf32>
      %c0_11 = arith.constant 0 : index
      %c0_12 = arith.constant 0 : index
      %13 = vector.load %arg8[%c0_11, %c0_12] : memref<8x128xf32, #tpu.memory_space<vmem>>, vector<8x128xf32>
      tpu.vector_store %arg8[%c0_11, %c0_12], %12 {strides = array<i32>} : memref<8x128xf32, #tpu.memory_space<vmem>>, vector<8x128xf32>,
    } else {
    }
    %c0 = arith.constant 0 : index
    %c0_1 = arith.constant 0 : index
    %3 = vector.load %arg8[%c0, %c0_1] : memref<8x128xf32, #tpu.memory_space<vmem>>, vector<8x128xf32>
    %c0_2 = arith.constant 0 : index
    %c0_3 = arith.constant 0 : index
    %4 = vector.load %arg3[%c0_2, %c0_3] : memref<8x128xf32, #tpu.memory_space<vmem>>, vector<8x128xf32>
    %c0_4 = arith.constant 0 : index
    %c0_5 = arith.constant 0 : index
    %5 = vector.load %arg4[%c0_4, %c0_5] : memref<128x128xf32, #tpu.memory_space<vmem>>, vector<128x128xf32>
    %cst = arith.constant dense<0.000000e+00> : vector<8x128xf32>
    %6 = tpu.matmul %4, %5, %cst {dimension_numbers = #tpu.dot_dimension_numbers<[1], [0], [0], [1], [0, 0, 1, 1], [], []>} : vector<8x128xf32>, vector<128x128xf32>, vector<8x128xf32> -> vector<8x128xf32>
    %7 = arith.addf %3, %6 : vector<8x128xf32>
    %c0_6 = arith.constant 0 : index
    %c0_7 = arith.constant 0 : index
    %8 = vector.load %arg8[%c0_6, %c0_7] : memref<8x128xf32, #tpu.memory_space<vmem>>, vector<8x128xf32>
    tpu.vector_store %arg8[%c0_6, %c0_7], %7 {strides = array<i32>} : memref<8x128xf32, #tpu.memory_space<vmem>>, vector<8x128xf32>,
    %c0_i32_8 = arith.constant 0 : i32
    %9 = arith.cmpi eq, %arg2, %c0_i32_8 : i32
    %10 = arith.extui %9 : i1 to i32
    %c0_i32_9 = arith.constant 0 : i32
    %11 = arith.cmpi ne, %10, %c0_i32_9 : i32
    scf.if %11 {
      %c0_10 = arith.constant 0 : index
      %c0_11 = arith.constant 0 : index
      %12 = vector.load %arg8[%c0_10, %c0_11] : memref<8x128xf32, #tpu.memory_space<vmem>>, vector<8x128xf32>
      %c0_12 = arith.constant 0 : index
      %c0_13 = arith.constant 0 : index
      %13 = vector.load %arg5[%c0_12, %c0_13] : memref<8x1xf32, #tpu.memory_space<vmem>>, vector<8x1xf32>
      %14 = vector.broadcast %13 : vector<8x1xf32> to vector<8x128xf32>
      %15 = arith.mulf %12, %14 : vector<8x128xf32>
      %c0_14 = arith.constant 0 : index
      %c0_15 = arith.constant 0 : index
      %16 = vector.load %arg6[%c0_14, %c0_15] : memref<1x128xf32, #tpu.memory_space<vmem>>, vector<1x128xf32>
      %17 = vector.broadcast %16 : vector<1x128xf32> to vector<8x128xf32>
      %18 = arith.mulf %15, %17 : vector<8x128xf32>
      %c0_16 = arith.constant 0 : index
      %c0_17 = arith.constant 0 : index
      %19 = vector.load %arg7[%c0_16, %c0_17] : memref<8x128xf32, #tpu.memory_space<vmem>>, vector<8x128xf32>
      tpu.vector_store %arg7[%c0_16, %c0_17], %18 {strides = array<i32>} : memref<8x128xf32, #tpu.memory_space<vmem>>, vector<8x128xf32>,
    } else {
    }
    return
  }
  func.func @transform_0(%arg0: i32, %arg1: i32, %arg2: i32) -> (i32, i32) {
    %c0_i32 = arith.constant 0 : i32
    return %arg0, %arg2 : i32, i32
  }
  func.func @transform_1(%arg0: i32, %arg1: i32, %arg2: i32) -> (i32, i32) {
    %c0_i32 = arith.constant 0 : i32
    return %arg2, %arg1 : i32, i32
  }
  func.func @transform_2(%arg0: i32, %arg1: i32, %arg2: i32) -> (i32, i32) {
    %c0_i32 = arith.constant 0 : i32
    %c0_i32_0 = arith.constant 0 : i32
    return %arg0, %c0_i32 : i32, i32
  }
  func.func @transform_3(%arg0: i32, %arg1: i32, %arg2: i32) -> (i32, i32) {
    %c0_i32 = arith.constant 0 : i32
    %c0_i32_0 = arith.constant 0 : i32
    return %c0_i32, %arg1 : i32, i32
  }
  func.func @transform_4(%arg0: i32, %arg1: i32, %arg2: i32) -> (i32, i32) {
    %c0_i32 = arith.constant 0 : i32
    return %arg0, %arg1 : i32, i32
  }
}

</mosaic_0001>

<bundles_post_ra>
// kernel: normed_linear.1
= control target key start
LH: loop header
LB: loop body
LE: loop exit
PB: predicated region body
PF: predicated region fallthrough
CT: control target
= control target key end

     0   :  { %v227_v1 = vmov 0.0   ;;  %vm228_vm0 = vmmov 0   ;;  %v229_v3 = vmov 0   ;;  %s316_s0 = inlined_call_operand.vmem [shape: f32[8,128], index: 0, kind: input, shape index: {}]   ;;  %s317_s1 = inlined_call_operand.vmem [shape: f32[128,128], index: 1, kind: input, shape index: {}]   ;;  %s318_s2 = inlined_call_operand.vmem [shape: f32[8,1], index: 2, kind: input, shape index: {}]   ;;  %s319_s3 = inlined_call_operand.vmem [shape: f32[1,128], index: 3, kind: input, shape index: {}]   ;;  %s320_s4 = inlined_call_operand.hbm [shape: f32[8,128], index: 4, kind: output, shape index: {}]  }
   0x1   :  { %v40_v0 = vld [vmem:[%s317_s1 + $0x78] sm:$0xff]  ;;  %165 = vmatprep.subr.mxu0 %v227_v1  ;;  %v39_v2 = vld [vmem:[%s317_s1 + $0x70] sm:$0xff]  ;;  %197 = vmatprep.mubr.msk.f32.mxu0 %vm228_vm0, %v227_v1  ;;  %v38_v4 = vld [vmem:[%s317_s1 + $0x68] sm:$0xff] }
   0x2   :  { %166 = vmatpush3.msra.mxu0 %v40_v0  ;;  %204 = vset.pattern.permute.xlu0 %v229_v3  ;;  %v37_v5 = vld [vmem:[%s317_s1 + $0x60] sm:$0xff] }
   0x3   :  { %167 = vmatprep.subr.mxu0 %v227_v1  ;;  %v117_v6 = vld [vmem:[%s318_s2] sm:$0xff] }
   0x4   :  { %168 = vmatpush3.msra.mxu0 %v39_v2  ;;  %120 = vperm.xlu0 %204, %v117_v6  }
   0x5   :  { %169 = vmatprep.subr.mxu0 %v227_v1 }
   0x6   :  { %170 = vmatpush3.msra.mxu0 %v38_v4 }
   0x7   :  { %9 = vsyncpa [#allocation4], 0  ;;  %171 = vmatprep.subr.mxu0 %v227_v1  ;;  %v36_v7 = vld [vmem:[%s317_s1 + $0x58] sm:$0xff]  ;;  %v35_v8 = vld [vmem:[%s317_s1 + $0x50] sm:$0xff]  ;;  %s230_s26 = smov [#allocation3]  }
   0x8   :  { %172 = vmatpush3.msra.mxu0 %v37_v5  ;;  %v34_v9 = vld [vmem:[%s317_s1 + $0x48] sm:$0xff]  ;;  %v33_v10 = vld [vmem:[%s317_s1 + $0x40] sm:$0xff]  ;;  %v32_v11 = vld [vmem:[%s317_s1 + $0x38] sm:$0xff]  ;;  %s139_s27 = sshll.u32 %s230_s26, 4  ;;  %s140_s27 = int_to_ptr.vmem [resolvable:$true] %s139_s27 }
   0x9   :  { %173 = vmatprep.subr.mxu0 %v227_v1  ;;  %v31_v12 = vld [vmem:[%s317_s1 + $0x30] sm:$0xff]  ;;  %v30_v13 = vld [vmem:[%s317_s1 + $0x28] sm:$0xff]  ;;  %v29_v14 = vld [vmem:[%s317_s1 + $0x20] sm:$0xff]  ;;  %p210_p1 = scmp.lt.s32.totalorder %s140_s27, %s140_s27 }
   0xa   :  { %174 = vmatpush3.msra.mxu0 %v36_v7  ;;  %v28_v15 = vld [vmem:[%s317_s1 + $0x18] sm:$0xff]  ;;  %v27_v16 = vld [vmem:[%s317_s1 + $0x10] sm:$0xff]  ;;  %v26_v17 = vld [vmem:[%s317_s1 + $0x8] sm:$0xff] }
   0xb   :  { %175 = vmatprep.subr.mxu0 %v227_v1  ;;  %v25_v18 = vld [vmem:[%s317_s1] sm:$0xff]  ;;  %s205_s1 = scalar_lea.vmem %s140_s27, 128 }
   0xc   :  { %176 = vmatpush3.msra.mxu0 %v35_v8  ;;  %v24_v19 = vld [vmem:[%s316_s0] sm:$0xff]  ;;  %p206_p0 = scmp.ne.s32.totalorder %s140_s27, %s205_s1  ;;  %p211_p2 = scmp.lt.s32.totalorder %s205_s1, %s205_s1 }
   0xd   :  { %177 = vmatprep.subr.mxu0 %v227_v1  ;;  %v147_v22 = vld [vmem:[%s319_s3] ss:$0 sm:$0xff] }
   0xe   :  { %178 = vmatpush3.msra.mxu0 %v34_v9  ;;  %p212_p3 = por %p211_p2, %p210_p1 }
   0xf   :  { %179 = vmatprep.subr.mxu0 %v227_v1 }
  0x10   :  { %180 = vmatpush3.msra.mxu0 %v33_v10  ;;  %p213_p4 = pnand %p212_p3, %p206_p0 }
  0x11   :  { %181 = vmatprep.subr.mxu0 %v227_v1 }
  0x12   :  { %182 = vmatpush3.msra.mxu0 %v32_v11 }
  0x13   :  { %183 = vmatprep.subr.mxu0 %v227_v1 }
  0x14   :  { %184 = vmatpush3.msra.mxu0 %v31_v12 }
  0x15   :  { %185 = vmatprep.subr.mxu0 %v227_v1 }
  0x16   :  { %186 = vmatpush3.msra.mxu0 %v30_v13 }
  0x17   :  { %187 = vmatprep.subr.mxu0 %v227_v1 }
  0x18   :  { %188 = vmatpush3.msra.mxu0 %v29_v14 }
  0x19   :  { %189 = vmatprep.subr.mxu0 %v227_v1 }
  0x1a   :  { %190 = vmatpush3.msra.mxu0 %v28_v15 }
  0x1b   :  { %191 = vmatprep.subr.mxu0 %v227_v1 }
  0x1c   :  { %192 = vmatpush3.msra.mxu0 %v27_v16 }
  0x1d   :  { %193 = vmatprep.subr.mxu0 %v227_v1 }
  0x1e   :  { %194 = vmatpush3.msra.mxu0 %v26_v17 }
  0x1f   :  { %195 = vmatprep.subr.mxu0 %v227_v1 }
  0x20   :  { %196 = vmatpush3.msra.mxu0 %v25_v18 }
  0x21   :  { %198 = vmatmul.mubr.f32.vlgmr.msra.gmra.mxu0 %v24_v19 }
  0x7f   :  { %v121_v20 = vpop.permute.xlu0 %120 }
  0xe1   :  { %v107_v21 = vpop.f32.mrf.mxu0 }
  0xe2   :  { %v123_v23 = vmul.f32 %v121_v20, %v107_v21 }
  0xe3   :  { %v199_v24 = vpop.f32.mrf.mxu0 }
  0xe4   :  { %v131_v25 = vmul.f32 %v147_v22, %v123_v23 }
  0xe6   :  { %132 = vst [vmem:[#allocation3] sm:$0xff] %v131_v25 }
  0xe7   :  { %216 = shalt.err (!%p213_p4)
}
  0xe8   :  { %142 = dma.vmem_to_hbm [thread:$0]  %s140_s27, 128, %s320_s4, [#allocation4]  }
  0xe9   :  { %225 = dma.done.wait [#allocation4], 128  }
  0xea   :  { %226 = vsyncadd [#allocation4], 4294967168 }
  0xeb   :  { %146 = vsyncpa [#allocation4], 1 }

</bundles_post_ra>
